<compile_context>
chip_gen: v6e
topology: v6e:2x2x1
jax: 0.10.0
libtpu: 0.0.40
codegen_flags: <defaults>
</compile_context>

<pallas_src>
import math

import jax
import jax.numpy as jnp
from jax import lax
from jax.experimental import pallas as pl
from jax.experimental.pallas import tpu as pltpu


def nsp_head_kernel(x_ref, w_ref, ot_ref):
    # x_ref:  (tb, H)   activations, H lane-dense
    # w_ref:  (2, H)    weight in PyTorch layout, H lane-dense
    # ot_ref: (2, tb)   transposed logits, tb lane-dense
    ot_ref[...] = lax.dot_general(
        w_ref[...],
        x_ref[...],
        dimension_numbers=(((1,), (1,)), ((), ())),   # contract over H
        preferred_element_type=jnp.float32,
    ).astype(ot_ref.dtype)


def bert_nsp_head(pooled_output, weight, bias, *, block_b=512):
    """pooled_output: (B, H), weight: (2, H) (PyTorch layout), bias: (2,) -> (B, 2)."""
    B, H = pooled_output.shape
    assert weight.shape == (2, H)

    # B tile: grid over the batch only when it divides cleanly into lane-aligned
    # tiles; otherwise use the full array as one block (legal for any shape).
    if B > block_b and B % block_b == 0:
        tb = block_b
    else:
        tb = B
    grid = (B // tb,)

    out_t = pl.pallas_call(
        nsp_head_kernel,
        out_shape=jax.ShapeDtypeStruct((2, B), pooled_output.dtype),
        grid_spec=pltpu.PrefetchScalarGridSpec(
            num_scalar_prefetch=0,
            grid=grid,
            in_specs=[
                pl.BlockSpec((tb, H), lambda i: (i, 0)),   # x tile
                pl.BlockSpec((2, H), lambda i: (0, 0)),    # full weight, lane-dense
            ],
            out_specs=pl.BlockSpec((2, tb), lambda i: (0, i)),
        ),
        compiler_params=pltpu.CompilerParams(
            dimension_semantics=("parallel",),
        ),
    )(pooled_output, weight)

    # Lane-dense (2, B) -> (B, 2), bias added outside the kernel (XLA fuses this).
    return out_t.T + bias


def init_params(hidden_size, key):
    # Matches BertNSPHead._init_weight:
    #   kaiming_uniform_(weight (2, H), mode='fan_out', nonlinearity='relu')
    #   -> fan_out = 2, gain = sqrt(2), bound = gain * sqrt(3 / fan_out)
    #   bias zeroed.
    fan_out = 2
    gain = math.sqrt(2.0)
    bound = gain * math.sqrt(3.0 / fan_out)
    weight = jax.random.uniform(key, (2, hidden_size), jnp.float32, -bound, bound)
    bias = jnp.zeros((2,), jnp.float32)
    return weight, bias


if __name__ == "__main__":
    key = jax.random.PRNGKey(0)
    k_x, k_w, k_x2 = jax.random.split(key, 3)

    # Small demo shapes (single-block path).
    batch, hidden = 2, 32
    pooled_output = jax.random.normal(k_x, (batch, hidden), jnp.float32)
    weight, bias = init_params(hidden, k_w)

    out = bert_nsp_head(pooled_output, weight, bias)
    jax.block_until_ready(out)

    ref = pooled_output @ weight.T + bias
    assert out.shape == (batch, 2)
    assert jnp.allclose(out, ref, atol=1e-5, rtol=1e-5)

    # Gridded path (real batch: grid over B, lane-aligned tiles, parallel axis).
    big_b, big_h = 1024, 128
    x_big = jax.random.normal(k_x2, (big_b, big_h), jnp.float32)
    w_big, b_big = init_params(big_h, k_w)
    out_big = bert_nsp_head(x_big, w_big, b_big, block_b=512)
    jax.block_until_ready(out_big)
    ref_big = x_big @ w_big.T + b_big
    assert out_big.shape == (big_b, 2)
    assert jnp.allclose(out_big, ref_big, atol=1e-4, rtol=1e-4)

    print("KERNEL_OK")
</pallas_src>

<mosaic_0001>
module attributes {stable_mosaic.version = 11 : i64} {
  func.func @nsp_head_kernel(%arg0: i32, %arg1: memref<2x32xf32, #tpu.memory_space<vmem>>, %arg2: memref<2x32xf32, #tpu.memory_space<vmem>>, %arg3: memref<2x2xf32, #tpu.memory_space<vmem>>) attributes {dimension_semantics = [#tpu.dimension_semantics<parallel>], iteration_bounds = array<i64: 1>, scalar_prefetch = 0 : i64, scratch_operands = 0 : i64, tpu.core_type = #tpu.core_type<tc>, window_params = [{transform_indices = @transform_0, window_bounds = array<i64: 2, 32>}, {pipeline_mode = #tpu.pipeline_mode<synchronous>, transform_indices = @transform_1, window_bounds = array<i64: 2, 32>}, {transform_indices = @transform_2, window_bounds = array<i64: 2, 2>}]} {
    %c0 = arith.constant 0 : index
    %c0_0 = arith.constant 0 : index
    %0 = vector.load %arg2[%c0, %c0_0] : memref<2x32xf32, #tpu.memory_space<vmem>>, vector<2x32xf32>
    %c0_1 = arith.constant 0 : index
    %c0_2 = arith.constant 0 : index
    %1 = vector.load %arg1[%c0_1, %c0_2] : memref<2x32xf32, #tpu.memory_space<vmem>>, vector<2x32xf32>
    %cst = arith.constant dense<0.000000e+00> : vector<2x2xf32>
    %2 = tpu.matmul %0, %1, %cst {dimension_numbers = #tpu.dot_dimension_numbers<[1], [1], [0], [0], [0, 0, 1, 0], [], []>} : vector<2x32xf32>, vector<2x32xf32>, vector<2x2xf32> -> vector<2x2xf32>
    %c0_3 = arith.constant 0 : index
    %c0_4 = arith.constant 0 : index
    %3 = vector.load %arg3[%c0_3, %c0_4] : memref<2x2xf32, #tpu.memory_space<vmem>>, vector<2x2xf32>
    tpu.vector_store %arg3[%c0_3, %c0_4], %2 {strides = array<i32>} : memref<2x2xf32, #tpu.memory_space<vmem>>, vector<2x2xf32>,
    return
  }
  func.func @transform_0(%arg0: i32) -> (i32, i32) {
    %c0_i32 = arith.constant 0 : i32
    %c0_i32_0 = arith.constant 0 : i32
    return %arg0, %c0_i32 : i32, i32
  }
  func.func @transform_1(%arg0: i32) -> (i32, i32) {
    %c0_i32 = arith.constant 0 : i32
    %c0_i32_0 = arith.constant 0 : i32
    %c0_i32_1 = arith.constant 0 : i32
    return %c0_i32, %c0_i32_0 : i32, i32
  }
  func.func @transform_2(%arg0: i32) -> (i32, i32) {
    %c0_i32 = arith.constant 0 : i32
    %c0_i32_0 = arith.constant 0 : i32
    return %c0_i32, %arg0 : i32, i32
  }
}

</mosaic_0001>

<bundles_post_ra>
// kernel: tpu_custom_call.1
= control target key start
LH: loop header
LB: loop body
LE: loop exit
PB: predicated region body
PF: predicated region fallthrough
CT: control target
= control target key end

     0   :  { %7 = vsyncpa [#allocation3], 0  ;;  %s242_s0 = inlined_call_operand.hbm [shape: f32[2,32], index: 0, kind: input, shape index: {}]   ;;  %s243_s1 = inlined_call_operand.hbm [shape: f32[2,32], index: 1, kind: input, shape index: {}]   ;;  %s244_s2 = inlined_call_operand.hbm [shape: f32[2,2], index: 2, kind: output, shape index: {}]  }
   0x1   :  { %8 = vsyncpa [#allocation6], 0 }
   0x2   :  { %9 = vsyncpa [#allocation4], 0  ;;  %s213_s9 = smov [#allocation2]   ;;  %s214_s11 = smov [#allocation5]  }
   0x3   :  { %s16_s10 = sshll.u32 %s213_s9, 4  ;;  %s26_s12 = sshll.u32 %s214_s11, 4  ;;  %s17_s10 = int_to_ptr.vmem [resolvable:$true] %s16_s10  ;;  %s27_s12 = int_to_ptr.vmem [resolvable:$true] %s26_s12 }
   0x4   :  { %s155_s13 = scalar_lea.vmem %s17_s10, 32  ;;  %p160_p1 = scmp.lt.s32.totalorder %s17_s10, %s17_s10 }
   0x5   :  { %p156_p0 = scmp.ne.s32.totalorder %s17_s10, %s155_s13  ;;  %p161_p2 = scmp.lt.s32.totalorder %s155_s13, %s155_s13 }
   0x7   :  { %p162_p3 = por %p161_p2, %p160_p1 }
   0x9   :  { %p163_p4 = pnand %p162_p3, %p156_p0 }
   0xb   :  { %166 = shalt.err (!%p163_p4)
}
   0xc   :  { %19 = dma.hbm_to_vmem [thread:$0]  %s242_s0, 32, %s17_s10, [#allocation3]  }
   0xd   :  { %s175_s16 = scalar_lea.vmem %s27_s12, 32  ;;  %p180_p6 = scmp.lt.s32.totalorder %s27_s12, %s27_s12 }
   0xe   :  { %p176_p5 = scmp.ne.s32.totalorder %s27_s12, %s175_s16  ;;  %p181_p7 = scmp.lt.s32.totalorder %s175_s16, %s175_s16 }
  0x10   :  { %p182_p8 = por %p181_p7, %p180_p6 }
  0x12   :  { %p183_p9 = pnand %p182_p8, %p176_p5 }
  0x14   :  { %186 = shalt.err (!%p183_p9)
}
  0x15   :  { %29 = dma.hbm_to_vmem [thread:$0]  %s243_s1, 32, %s27_s12, [#allocation6]  }
  0x16   :  { %207 = dma.done.wait [#allocation3], 32  }
  0x17   :  { %208 = vsyncadd [#allocation3], 4294967264 }
  0x18   :  { %209 = dma.done.wait [#allocation6], 32  }
  0x19   :  { %210 = vsyncadd [#allocation6], 4294967264  ;;  %v215_v0 = vmov 0.0   ;;  %vm216_vm0 = vmmov 0   ;;  %vm38_vm1 = vcmask 261120   ;;  %s217_s0 = smov [#allocation7]  }
  0x1a   :  { %137 = vmatprep.subr.mxu0 %v215_v0  ;;  %139 = vmatprep.mubr.msk.f32.mxu0 %vm216_vm0, %v215_v0  ;;  %v37_v1 = vld [vmem:[#allocation2] sm:$0x3]  ;;  %v36_v2 = vld [vmem:[#allocation5] sm:$0x3]  ;;  %s123_s19 = sshll.u32 %s217_s0, 4  ;;  %vm115_vm2 = vcmask 9216   ;;  %s124_s19 = int_to_ptr.vmem [resolvable:$true] %s123_s19 }
  0x1b   :  { %138 = vmatpush3.xpose.msk.msra.mxu0 %vm38_vm1, %v37_v1  ;;  %s187_s1 = scalar_lea.vmem %s124_s19, 32  ;;  %p192_p11 = scmp.lt.s32.totalorder %s124_s19, %s124_s19 }
  0x1c   :  { %p188_p10 = scmp.ne.s32.totalorder %s124_s19, %s187_s1  ;;  %p193_p12 = scmp.lt.s32.totalorder %s187_s1, %s187_s1 }
  0x1e   :  { %140 = vmatmul.mubr.msk.f32.vlgmr.msra.gmra.mxu0 %vm38_vm1, %v36_v2  ;;  %p194_p13 = por %p193_p12, %p192_p11 }
  0x20   :  { %p195_p0 = pnand %p194_p13, %p188_p10 }
  0xde   :  { %v111_v3 = vpop.f32.mrf.mxu0 }
  0xdf   :  { %116 = vst.msk [vmem:[#allocation7] sm:$0x3] %vm115_vm2, %v111_v3 }
  0xe0   :  { %v141_v4 = vpop.f32.mrf.mxu0 }
  0xe1   :  { %198 = shalt.err (!%p195_p0)
}
  0xe2   :  { %126 = dma.vmem_to_hbm [thread:$0]  %s124_s19, 32, %s244_s2, [#allocation4]  }
  0xe3   :  { %211 = dma.done.wait [#allocation4], 32  }
  0xe4   :  { %212 = vsyncadd [#allocation4], 4294967264 }
  0xe5   :  { %130 = vsyncpa [#allocation3], 1 }
  0xe6   :  { %131 = vsyncpa [#allocation6], 1 }
  0xe7   :  { %132 = vsyncpa [#allocation4], 1 }

</bundles_post_ra>
